<compile_context>
chip_gen: v7x
topology: tpu7x:2x2x1
jax: 0.10.0
libtpu: 0.0.40
codegen_flags: <defaults>
</compile_context>

<pallas_src>
import functools

import jax
import jax.numpy as jnp
from jax.experimental import pallas as pl
from jax.experimental.pallas import tpu as pltpu


def _softplus(v):
    # Numerically stable softplus, matches nn.Softplus (beta=1) within fp tolerance.
    return jnp.maximum(v, 0.0) + jnp.log1p(jnp.exp(-jnp.abs(v)))


def _dualvae_kernel(n, fuse_first, g_ref, x1_ref, x2_ref, wemb_ref, *refs):
    """refs = mean-stack params, logstd-stack params, z_ref, kld_ref.

    Per stack (n VAE layers), fused first layer:
      [W0 (2H,H), b0 (1,H), W1 (H,H), b1 (1,H), ..., W_{n-1}, b_{n-1}]
    Split first layer (v5e-native K=128 dots):
      [W0_a (H,H), W0_b (H,H), b0 (1,H), W1, b1, ...]
    """
    per = (2 * n) if fuse_first else (2 * n + 1)
    mean_refs = refs[:per]
    log_refs = refs[per:2 * per]
    z_ref, kld_ref = refs[2 * per], refs[2 * per + 1]

    bf16 = jnp.bfloat16
    f32 = jnp.float32

    # --- DualEmb (shared weight, bias=False) ---
    x1 = x1_ref[...].astype(bf16)
    x2 = x2_ref[...].astype(bf16)
    wemb = wemb_ref[...]                                    # already bf16
    h1 = jnp.dot(x1, wemb, preferred_element_type=f32)      # MXU, f32 accumulate
    h2 = jnp.dot(x2, wemb, preferred_element_type=f32)
    h_prod = (h1 * h2).astype(bf16)                         # first half of cat([h1*h2, h1+h2])
    h_sum = (h1 + h2).astype(bf16)                          # second half
    if fuse_first:
        # Lane-contiguous concat -> one K=2H dot per stack (fills 256-deep MXU).
        h_cat = jnp.concatenate([h_prod, h_sum], axis=-1)   # (tm, 2H) bf16

    def run_stack(srefs):
        if fuse_first:
            w0, b0 = srefs[0], srefs[1]
            a = jnp.dot(h_cat, w0[...], preferred_element_type=f32) + b0[...]
            rest = srefs[2:]
        else:
            wa, wb, b0 = srefs[0], srefs[1], srefs[2]
            a = (jnp.dot(h_prod, wa[...], preferred_element_type=f32)
                 + jnp.dot(h_sum, wb[...], preferred_element_type=f32)
                 + b0[...])
            rest = srefs[3:]
        a = _softplus(a)
        for l in range(n - 1):
            w = rest[2 * l]
            b = rest[2 * l + 1]
            a = _softplus(jnp.dot(a.astype(bf16), w[...],
                                  preferred_element_type=f32) + b[...])
        return a

    mean = run_stack(mean_refs)          # (tm, H) f32
    logstd = run_stack(log_refs)         # (tm, H) f32

    # --- reparameterization (reuse s = exp(0.5*logstd); s*s == exp(logstd)) ---
    g = g_ref[...].astype(f32)
    s = jnp.exp(0.5 * logstd)
    z_ref[...] = (mean + g * s).astype(z_ref.dtype)

    # --- per-row partial KLD:  -0.5 * sum(1 + logstd - mean^2 - exp(logstd)) ---
    term = 1.0 + logstd - mean * mean - s * s
    kld_ref[...] = (-0.5) * jnp.sum(term, axis=-1, keepdims=True)


def prepare_dualvae_params(w_emb, mean_ws, mean_bs, logstd_ws, logstd_bs,
                           *, fuse_first_layer=True):
    """One-time weight preparation (hoisted out of the per-call wrapper).

    w_emb: (E, H) f32   -- PyTorch (H, E) weight, transposed, bias-free
    mean_ws/logstd_ws[0]: (2H, H); [l>0]: (H, H)  (already transposed to (in,out))
    mean_bs/logstd_bs[l]: (H,)
    """
    E, H = w_emb.shape
    n = len(mean_ws)
    assert len(mean_bs) == n and len(logstd_ws) == n and len(logstd_bs) == n
    bf16, f32 = jnp.bfloat16, jnp.float32

    def prep_stack(ws, bs):
        args = []
        w0 = ws[0].astype(bf16)                      # (2H, H)
        if fuse_first_layer:
            args.append(w0)
        else:
            args += [w0[:H], w0[H:]]                 # split (2H,H) -> two (H,H)
        args.append(bs[0].reshape(1, H).astype(f32))
        for l in range(1, n):
            args.append(ws[l].astype(bf16))
            args.append(bs[l].reshape(1, H).astype(f32))
        return args

    return {
        "emb_size": E,
        "hidden": H,
        "num_vae_layers": n,
        "fuse_first": bool(fuse_first_layer),
        "w_emb": w_emb.astype(bf16),
        "mean": prep_stack(mean_ws, mean_bs),
        "logstd": prep_stack(logstd_ws, logstd_bs),
    }


def _vmem_limit_bytes(tm, E, H, n):
    """Footprint estimate: single-buffered weights + double-buffered batch tiles
    + live f32 activations, with headroom."""
    w_bytes = E * H * 2                                       # DualEmb weight (bf16)
    per_stack = (2 * H) * H * 2 + (n - 1) * H * H * 2 + n * H * 4
    w_bytes += 2 * per_stack
    io_bytes = 2 * (tm * H * 4 + 2 * tm * E * 4 + tm * H * 4 + tm * 4)   # x2 buffers
    act_bytes = 10 * tm * H * 4                               # live f32 intermediates (rough)
    est = w_bytes + io_bytes + act_bytes
    limit = max(int(1.25 * est) + (4 << 20), 32 << 20)        # never below v6e/v7x default
    return min(limit, 128 << 20)                              # v7x physical cap is 64 MiB;
                                                              # toy/medium sizes stay well below


def dualvae_forward(gaussians, atom_repr1, atom_repr2, params, *, tm=None):
    """DualVAE forward.

    gaussians: (B, H) f32    atom_repr1/2: (B, E) f32
    params: output of prepare_dualvae_params.
    Returns (z, kld) with z: (B, H), kld: scalar.
    """
    B, E = atom_repr1.shape
    H = params["hidden"]
    n = params["num_vae_layers"]
    fuse_first = params["fuse_first"]
    assert params["emb_size"] == E
    assert gaussians.shape == (B, H)

    # Batch tile: whole batch for small B (grid=(1,)); cap at 512 rows — weights
    # are resident so only activations scale with tm, and bigger tiles amortize
    # the ~0.35us per-grid-step overhead in the HBM-streaming-bound regime.
    # (On v5e prefer 128-256; sweep if it matters.)
    if tm is None:
        tm = B if B <= 512 else 512
    assert B % tm == 0, "batch must be divisible by the batch tile"
    num_tiles = B // tm

    single = pl.Buffered(1)   # grid-invariant operands: no point double-buffering

    def const_spec(shape):
        return pl.BlockSpec(shape, lambda i: (0,) * len(shape), pipeline_mode=single)

    def stack_specs():
        specs = []
        if fuse_first:
            specs.append(const_spec((2 * H, H)))
        else:
            specs += [const_spec((H, H)), const_spec((H, H))]
        specs.append(const_spec((1, H)))
        for _ in range(1, n):
            specs.append(const_spec((H, H)))
            specs.append(const_spec((1, H)))
        return specs

    in_specs = ([pl.BlockSpec((tm, H), lambda i: (i, 0)),    # gaussians tile
                 pl.BlockSpec((tm, E), lambda i: (i, 0)),    # atom_repr1 tile
                 pl.BlockSpec((tm, E), lambda i: (i, 0)),    # atom_repr2 tile
                 const_spec((E, H))]                         # shared DualEmb weight
                + stack_specs() + stack_specs())

    out_shape = (jax.ShapeDtypeStruct((B, H), gaussians.dtype),   # z
                 jax.ShapeDtypeStruct((B, 1), jnp.float32))       # per-row kld partials
    out_specs = (pl.BlockSpec((tm, H), lambda i: (i, 0)),
                 pl.BlockSpec((tm, 1), lambda i: (i, 0)))

    # Advisory cost estimate for XLA's scheduler around the custom call.
    flops = 4 * B * E * H + 4 * B * H * H * (n + 1)
    transcendentals = (4 * n + 1) * B * H
    bytes_accessed = ((B * H + 2 * B * E) * 4
                      + (E * H + 2 * ((n + 1) * H * H)) * 2
                      + 2 * n * H * 4
                      + (B * H + B) * 4)

    kernel = functools.partial(_dualvae_kernel, n, fuse_first)
    z, kld_rows = pl.pallas_call(
        kernel,
        out_shape=out_shape,
        grid=(num_tiles,),
        in_specs=in_specs,
        out_specs=out_specs,
        compiler_params=pltpu.CompilerParams(
            dimension_semantics=("parallel",),        # batch tiles are independent
            vmem_limit_bytes=_vmem_limit_bytes(tm, E, H, n)),
        cost_estimate=pl.CostEstimate(flops=flops,
                                      transcendentals=transcendentals,
                                      bytes_accessed=bytes_accessed),
    )(gaussians, atom_repr1, atom_repr2, params["w_emb"],
      *params["mean"], *params["logstd"])

    return z, jnp.sum(kld_rows)


# ----------------------------------------------------------------------------- #
# Pure-JAX reference (f32) of the PyTorch module, for a loose sanity check.
def _reference(gaussians, x1, x2, w_emb, mean_ws, mean_bs, log_ws, log_bs):
    h1 = x1 @ w_emb
    h2 = x2 @ w_emb
    h = jnp.concatenate([h1 * h2, h1 + h2], axis=-1)

    def stack(a, ws, bs):
        for w, b in zip(ws, bs):
            a = jax.nn.softplus(a @ w + b)
        return a

    mean = stack(h, mean_ws, mean_bs)
    logstd = stack(h, log_ws, log_bs)
    z = mean + gaussians * jnp.exp(0.5 * logstd)
    kld = -0.5 * jnp.sum(1.0 + logstd - jnp.square(mean) - jnp.exp(logstd))
    return z, kld


def _init_linear(key, fan_in, fan_out, bias=True):
    """PyTorch nn.Linear-style init (uniform +/- 1/sqrt(fan_in)); weight stored (in, out)."""
    kw, kb = jax.random.split(key)
    bound = float(fan_in) ** -0.5
    w = jax.random.uniform(kw, (fan_in, fan_out), jnp.float32, -bound, bound)
    b = (jax.random.uniform(kb, (fan_out,), jnp.float32, -bound, bound)
         if bias else None)
    return w, b


if __name__ == "__main__":
    # DualVAE(emb_size=E, hidden_size=H, num_layers=3) -> VAE stacks have 2 layers each.
    B, E, H, num_layers = 16, 128, 128, 3
    n_vae = num_layers - 1

    key = jax.random.PRNGKey(0)
    keys = jax.random.split(key, 4 + 2 * n_vae)
    kg, kx1, kx2, kemb = keys[:4]
    layer_keys = keys[4:]

    gaussians = jax.random.normal(kg, (B, H), dtype=jnp.float32)
    atom_repr1 = jax.random.normal(kx1, (B, E), dtype=jnp.float32)
    atom_repr2 = jax.random.normal(kx2, (B, E), dtype=jnp.float32)

    w_emb, _ = _init_linear(kemb, E, H, bias=False)   # DualEmb.linear (bias=False)

    mean_ws, mean_bs, logstd_ws, logstd_bs = [], [], [], []
    for l in range(n_vae):
        km, kl = jax.random.split(layer_keys[l], 2)
        fan_in = 2 * H if l == 0 else H
        wm, bm = _init_linear(km, fan_in, H)
        wl, bl = _init_linear(kl, fan_in, H)
        mean_ws.append(wm); mean_bs.append(bm)
        logstd_ws.append(wl); logstd_bs.append(bl)

    # One-time weight prep (bf16 cast / bias reshape) — hoisted out of the forward.
    params = prepare_dualvae_params(w_emb, mean_ws, mean_bs, logstd_ws, logstd_bs,
                                    fuse_first_layer=True)
    params = jax.block_until_ready(params)

    z, kld = dualvae_forward(gaussians, atom_repr1, atom_repr2, params)
    z, kld = jax.block_until_ready((z, kld))

    assert z.shape == (B, H)
    assert bool(jnp.all(jnp.isfinite(z))) and bool(jnp.isfinite(kld))

    # Loose sanity check against the f32 reference (kernel uses bf16 matmul operands).
    z_ref, kld_ref = _reference(gaussians, atom_repr1, atom_repr2,
                                w_emb, mean_ws, mean_bs, logstd_ws, logstd_bs)
    assert float(jnp.max(jnp.abs(z - z_ref))) < 0.1
    assert abs(float(kld) - float(kld_ref)) <= 0.03 * abs(float(kld_ref)) + 1.0

    # Also exercise the split-first-layer (v5e-native) path for parity.
    params_split = prepare_dualvae_params(w_emb, mean_ws, mean_bs,
                                          logstd_ws, logstd_bs,
                                          fuse_first_layer=False)
    z2, kld2 = jax.block_until_ready(
        dualvae_forward(gaussians, atom_repr1, atom_repr2, params_split))
    assert float(jnp.max(jnp.abs(z2 - z_ref))) < 0.1
    assert abs(float(kld2) - float(kld_ref)) <= 0.03 * abs(float(kld_ref)) + 1.0

    print("KERNEL_OK")
</pallas_src>

<mosaic_0001>
module attributes {stable_mosaic.version = 11 : i64} {
  func.func @_dualvae_kernel(%arg0: i32, %arg1: memref<16x128xf32, #tpu.memory_space<vmem>>, %arg2: memref<16x128xf32, #tpu.memory_space<vmem>>, %arg3: memref<16x128xf32, #tpu.memory_space<vmem>>, %arg4: memref<128x128xbf16, #tpu.memory_space<vmem>>, %arg5: memref<256x128xbf16, #tpu.memory_space<vmem>>, %arg6: memref<1x128xf32, #tpu.memory_space<vmem>>, %arg7: memref<128x128xbf16, #tpu.memory_space<vmem>>, %arg8: memref<1x128xf32, #tpu.memory_space<vmem>>, %arg9: memref<256x128xbf16, #tpu.memory_space<vmem>>, %arg10: memref<1x128xf32, #tpu.memory_space<vmem>>, %arg11: memref<128x128xbf16, #tpu.memory_space<vmem>>, %arg12: memref<1x128xf32, #tpu.memory_space<vmem>>, %arg13: memref<16x128xf32, #tpu.memory_space<vmem>>, %arg14: memref<16x1xf32, #tpu.memory_space<vmem>>) attributes {dimension_semantics = [#tpu.dimension_semantics<parallel>], iteration_bounds = array<i64: 1>, scalar_prefetch = 0 : i64, scratch_operands = 0 : i64, tpu.core_type = #tpu.core_type<tc>, window_params = [{transform_indices = @transform_0, window_bounds = array<i64: 16, 128>}, {transform_indices = @transform_1, window_bounds = array<i64: 16, 128>}, {transform_indices = @transform_2, window_bounds = array<i64: 16, 128>}, {pipeline_mode = #tpu.pipeline_mode<synchronous>, transform_indices = @transform_3, window_bounds = array<i64: 128, 128>}, {pipeline_mode = #tpu.pipeline_mode<synchronous>, transform_indices = @transform_4, window_bounds = array<i64: 256, 128>}, {pipeline_mode = #tpu.pipeline_mode<synchronous>, transform_indices = @transform_5, window_bounds = array<i64: 1, 128>}, {pipeline_mode = #tpu.pipeline_mode<synchronous>, transform_indices = @transform_6, window_bounds = array<i64: 128, 128>}, {pipeline_mode = #tpu.pipeline_mode<synchronous>, transform_indices = @transform_7, window_bounds = array<i64: 1, 128>}, {pipeline_mode = #tpu.pipeline_mode<synchronous>, transform_indices = @transform_8, window_bounds = array<i64: 256, 128>}, {pipeline_mode = #tpu.pipeline_mode<synchronous>, transform_indices = @transform_9, window_bounds = array<i64: 1, 128>}, {pipeline_mode = #tpu.pipeline_mode<synchronous>, transform_indices = @transform_10, window_bounds = array<i64: 128, 128>}, {pipeline_mode = #tpu.pipeline_mode<synchronous>, transform_indices = @transform_11, window_bounds = array<i64: 1, 128>}, {transform_indices = @transform_12, window_bounds = array<i64: 16, 128>}, {transform_indices = @transform_13, window_bounds = array<i64: 16, 1>}]} {
    %c0 = arith.constant 0 : index
    %c0_0 = arith.constant 0 : index
    %0 = vector.load %arg2[%c0, %c0_0] : memref<16x128xf32, #tpu.memory_space<vmem>>, vector<16x128xf32>
    %1 = arith.truncf %0 : vector<16x128xf32> to vector<16x128xbf16>
    %c0_1 = arith.constant 0 : index
    %c0_2 = arith.constant 0 : index
    %2 = vector.load %arg3[%c0_1, %c0_2] : memref<16x128xf32, #tpu.memory_space<vmem>>, vector<16x128xf32>
    %3 = arith.truncf %2 : vector<16x128xf32> to vector<16x128xbf16>
    %c0_3 = arith.constant 0 : index
    %c0_4 = arith.constant 0 : index
    %4 = vector.load %arg4[%c0_3, %c0_4] : memref<128x128xbf16, #tpu.memory_space<vmem>>, vector<128x128xbf16>
    %cst = arith.constant dense<0.000000e+00> : vector<16x128xf32>
    %5 = tpu.matmul %1, %4, %cst {dimension_numbers = #tpu.dot_dimension_numbers<[1], [0], [0], [1], [0, 0, 1, 1], [], []>} : vector<16x128xbf16>, vector<128x128xbf16>, vector<16x128xf32> -> vector<16x128xf32>
    %cst_5 = arith.constant dense<0.000000e+00> : vector<16x128xf32>
    %6 = tpu.matmul %3, %4, %cst_5 {dimension_numbers = #tpu.dot_dimension_numbers<[1], [0], [0], [1], [0, 0, 1, 1], [], []>} : vector<16x128xbf16>, vector<128x128xbf16>, vector<16x128xf32> -> vector<16x128xf32>
    %7 = arith.mulf %5, %6 : vector<16x128xf32>
    %8 = arith.truncf %7 : vector<16x128xf32> to vector<16x128xbf16>
    %9 = arith.addf %5, %6 : vector<16x128xf32>
    %10 = arith.truncf %9 : vector<16x128xf32> to vector<16x128xbf16>
    %11 = tpu.concatenate %8, %10 in 1 : vector<16x128xbf16>, vector<16x128xbf16> -> vector<16x256xbf16>
    %c0_6 = arith.constant 0 : index
    %c0_7 = arith.constant 0 : index
    %12 = vector.load %arg5[%c0_6, %c0_7] : memref<256x128xbf16, #tpu.memory_space<vmem>>, vector<256x128xbf16>
    %cst_8 = arith.constant dense<0.000000e+00> : vector<16x128xf32>
    %13 = tpu.matmul %11, %12, %cst_8 {dimension_numbers = #tpu.dot_dimension_numbers<[1], [0], [0], [1], [0, 0, 1, 1], [], []>} : vector<16x256xbf16>, vector<256x128xbf16>, vector<16x128xf32> -> vector<16x128xf32>
    %c0_9 = arith.constant 0 : index
    %c0_10 = arith.constant 0 : index
    %14 = vector.load %arg6[%c0_9, %c0_10] : memref<1x128xf32, #tpu.memory_space<vmem>>, vector<1x128xf32>
    %15 = vector.broadcast %14 : vector<1x128xf32> to vector<16x128xf32>
    %16 = arith.addf %13, %15 : vector<16x128xf32>
    %cst_11 = arith.constant 0.000000e+00 : f32
    %17 = vector.broadcast %cst_11 : f32 to vector<16x128xf32>
    %18 = arith.maximumf %16, %17 : vector<16x128xf32>
    %19 = math.absf %16 : vector<16x128xf32>
    %cst_12 = arith.constant 0.000000e+00 : f32
    %20 = vector.broadcast %cst_12 : f32 to vector<16x128xf32>
    %21 = arith.subf %20, %19 : vector<16x128xf32>
    %22 = math.exp %21 : vector<16x128xf32>
    %23 = math.log1p %22 : vector<16x128xf32>
    %24 = arith.addf %18, %23 : vector<16x128xf32>
    %25 = arith.truncf %24 : vector<16x128xf32> to vector<16x128xbf16>
    %c0_13 = arith.constant 0 : index
    %c0_14 = arith.constant 0 : index
    %26 = vector.load %arg7[%c0_13, %c0_14] : memref<128x128xbf16, #tpu.memory_space<vmem>>, vector<128x128xbf16>
    %cst_15 = arith.constant dense<0.000000e+00> : vector<16x128xf32>
    %27 = tpu.matmul %25, %26, %cst_15 {dimension_numbers = #tpu.dot_dimension_numbers<[1], [0], [0], [1], [0, 0, 1, 1], [], []>} : vector<16x128xbf16>, vector<128x128xbf16>, vector<16x128xf32> -> vector<16x128xf32>
    %c0_16 = arith.constant 0 : index
    %c0_17 = arith.constant 0 : index
    %28 = vector.load %arg8[%c0_16, %c0_17] : memref<1x128xf32, #tpu.memory_space<vmem>>, vector<1x128xf32>
    %29 = vector.broadcast %28 : vector<1x128xf32> to vector<16x128xf32>
    %30 = arith.addf %27, %29 : vector<16x128xf32>
    %cst_18 = arith.constant 0.000000e+00 : f32
    %31 = vector.broadcast %cst_18 : f32 to vector<16x128xf32>
    %32 = arith.maximumf %30, %31 : vector<16x128xf32>
    %33 = math.absf %30 : vector<16x128xf32>
    %cst_19 = arith.constant 0.000000e+00 : f32
    %34 = vector.broadcast %cst_19 : f32 to vector<16x128xf32>
    %35 = arith.subf %34, %33 : vector<16x128xf32>
    %36 = math.exp %35 : vector<16x128xf32>
    %37 = math.log1p %36 : vector<16x128xf32>
    %38 = arith.addf %32, %37 : vector<16x128xf32>
    %c0_20 = arith.constant 0 : index
    %c0_21 = arith.constant 0 : index
    %39 = vector.load %arg9[%c0_20, %c0_21] : memref<256x128xbf16, #tpu.memory_space<vmem>>, vector<256x128xbf16>
    %cst_22 = arith.constant dense<0.000000e+00> : vector<16x128xf32>
    %40 = tpu.matmul %11, %39, %cst_22 {dimension_numbers = #tpu.dot_dimension_numbers<[1], [0], [0], [1], [0, 0, 1, 1], [], []>} : vector<16x256xbf16>, vector<256x128xbf16>, vector<16x128xf32> -> vector<16x128xf32>
    %c0_23 = arith.constant 0 : index
    %c0_24 = arith.constant 0 : index
    %41 = vector.load %arg10[%c0_23, %c0_24] : memref<1x128xf32, #tpu.memory_space<vmem>>, vector<1x128xf32>
    %42 = vector.broadcast %41 : vector<1x128xf32> to vector<16x128xf32>
    %43 = arith.addf %40, %42 : vector<16x128xf32>
    %cst_25 = arith.constant 0.000000e+00 : f32
    %44 = vector.broadcast %cst_25 : f32 to vector<16x128xf32>
    %45 = arith.maximumf %43, %44 : vector<16x128xf32>
    %46 = math.absf %43 : vector<16x128xf32>
    %cst_26 = arith.constant 0.000000e+00 : f32
    %47 = vector.broadcast %cst_26 : f32 to vector<16x128xf32>
    %48 = arith.subf %47, %46 : vector<16x128xf32>
    %49 = math.exp %48 : vector<16x128xf32>
    %50 = math.log1p %49 : vector<16x128xf32>
    %51 = arith.addf %45, %50 : vector<16x128xf32>
    %52 = arith.truncf %51 : vector<16x128xf32> to vector<16x128xbf16>
    %c0_27 = arith.constant 0 : index
    %c0_28 = arith.constant 0 : index
    %53 = vector.load %arg11[%c0_27, %c0_28] : memref<128x128xbf16, #tpu.memory_space<vmem>>, vector<128x128xbf16>
    %cst_29 = arith.constant dense<0.000000e+00> : vector<16x128xf32>
    %54 = tpu.matmul %52, %53, %cst_29 {dimension_numbers = #tpu.dot_dimension_numbers<[1], [0], [0], [1], [0, 0, 1, 1], [], []>} : vector<16x128xbf16>, vector<128x128xbf16>, vector<16x128xf32> -> vector<16x128xf32>
    %c0_30 = arith.constant 0 : index
    %c0_31 = arith.constant 0 : index
    %55 = vector.load %arg12[%c0_30, %c0_31] : memref<1x128xf32, #tpu.memory_space<vmem>>, vector<1x128xf32>
    %56 = vector.broadcast %55 : vector<1x128xf32> to vector<16x128xf32>
    %57 = arith.addf %54, %56 : vector<16x128xf32>
    %cst_32 = arith.constant 0.000000e+00 : f32
    %58 = vector.broadcast %cst_32 : f32 to vector<16x128xf32>
    %59 = arith.maximumf %57, %58 : vector<16x128xf32>
    %60 = math.absf %57 : vector<16x128xf32>
    %cst_33 = arith.constant 0.000000e+00 : f32
    %61 = vector.broadcast %cst_33 : f32 to vector<16x128xf32>
    %62 = arith.subf %61, %60 : vector<16x128xf32>
    %63 = math.exp %62 : vector<16x128xf32>
    %64 = math.log1p %63 : vector<16x128xf32>
    %65 = arith.addf %59, %64 : vector<16x128xf32>
    %c0_34 = arith.constant 0 : index
    %c0_35 = arith.constant 0 : index
    %66 = vector.load %arg1[%c0_34, %c0_35] : memref<16x128xf32, #tpu.memory_space<vmem>>, vector<16x128xf32>
    %cst_36 = arith.constant 5.000000e-01 : f32
    %67 = vector.broadcast %cst_36 : f32 to vector<16x128xf32>
    %68 = arith.mulf %67, %65 : vector<16x128xf32>
    %69 = math.exp %68 : vector<16x128xf32>
    %70 = arith.mulf %66, %69 : vector<16x128xf32>
    %71 = arith.addf %38, %70 : vector<16x128xf32>
    %c0_37 = arith.constant 0 : index
    %c0_38 = arith.constant 0 : index
    %72 = vector.load %arg13[%c0_37, %c0_38] : memref<16x128xf32, #tpu.memory_space<vmem>>, vector<16x128xf32>
    tpu.vector_store %arg13[%c0_37, %c0_38], %71 {strides = array<i32>} : memref<16x128xf32, #tpu.memory_space<vmem>>, vector<16x128xf32>,
    %cst_39 = arith.constant 1.000000e+00 : f32
    %73 = vector.broadcast %cst_39 : f32 to vector<16x128xf32>
    %74 = arith.addf %73, %65 : vector<16x128xf32>
    %75 = arith.mulf %38, %38 : vector<16x128xf32>
    %76 = arith.subf %74, %75 : vector<16x128xf32>
    %77 = arith.mulf %69, %69 : vector<16x128xf32>
    %78 = arith.subf %76, %77 : vector<16x128xf32>
    %cst_40 = arith.constant dense<0.000000e+00> : vector<16xf32>
    %79 = vector.multi_reduction <add>, %78, %cst_40 [1] : vector<16x128xf32> to vector<16xf32>
    %80 = vector.shape_cast %79 : vector<16xf32> to vector<16x1xf32>
    %cst_41 = arith.constant -5.000000e-01 : f32
    %81 = vector.broadcast %cst_41 : f32 to vector<16x1xf32>
    %82 = arith.mulf %81, %80 : vector<16x1xf32>
    %c0_42 = arith.constant 0 : index
    %c0_43 = arith.constant 0 : index
    %83 = vector.load %arg14[%c0_42, %c0_43] : memref<16x1xf32, #tpu.memory_space<vmem>>, vector<16x1xf32>
    tpu.vector_store %arg14[%c0_42, %c0_43], %82 {strides = array<i32>} : memref<16x1xf32, #tpu.memory_space<vmem>>, vector<16x1xf32>,
    return
  }
  func.func @transform_0(%arg0: i32) -> (i32, i32) {
    %c0_i32 = arith.constant 0 : i32
    %c0_i32_0 = arith.constant 0 : i32
    return %arg0, %c0_i32 : i32, i32
  }
  func.func @transform_1(%arg0: i32) -> (i32, i32) {
    %c0_i32 = arith.constant 0 : i32
    %c0_i32_0 = arith.constant 0 : i32
    return %arg0, %c0_i32 : i32, i32
  }
  func.func @transform_2(%arg0: i32) -> (i32, i32) {
    %c0_i32 = arith.constant 0 : i32
    %c0_i32_0 = arith.constant 0 : i32
    return %arg0, %c0_i32 : i32, i32
  }
  func.func @transform_3(%arg0: i32) -> (i32, i32) {
    %c0_i32 = arith.constant 0 : i32
    %c0_i32_0 = arith.constant 0 : i32
    %c0_i32_1 = arith.constant 0 : i32
    return %c0_i32, %c0_i32_0 : i32, i32
  }
  func.func @transform_4(%arg0: i32) -> (i32, i32) {
    %c0_i32 = arith.constant 0 : i32
    %c0_i32_0 = arith.constant 0 : i32
    %c0_i32_1 = arith.constant 0 : i32
    return %c0_i32, %c0_i32_0 : i32, i32
  }
  func.func @transform_5(%arg0: i32) -> (i32, i32) {
    %c0_i32 = arith.constant 0 : i32
    %c0_i32_0 = arith.constant 0 : i32
    %c0_i32_1 = arith.constant 0 : i32
    return %c0_i32, %c0_i32_0 : i32, i32
  }
  func.func @transform_6(%arg0: i32) -> (i32, i32) {
    %c0_i32 = arith.constant 0 : i32
    %c0_i32_0 = arith.constant 0 : i32
    %c0_i32_1 = arith.constant 0 : i32
    return %c0_i32, %c0_i32_0 : i32, i32
  }
  func.func @transform_7(%arg0: i32) -> (i32, i32) {
    %c0_i32 = arith.constant 0 : i32
    %c0_i32_0 = arith.constant 0 : i32
    %c0_i32_1 = arith.constant 0 : i32
    return %c0_i32, %c0_i32_0 : i32, i32
  }
  func.func @transform_8(%arg0: i32) -> (i32, i32) {
    %c0_i32 = arith.constant 0 : i32
    %c0_i32_0 = arith.constant 0 : i32
    %c0_i32_1 = arith.constant 0 : i32
    return %c0_i32, %c0_i32_0 : i32, i32
  }
  func.func @transform_9(%arg0: i32) -> (i32, i32) {
    %c0_i32 = arith.constant 0 : i32
    %c0_i32_0 = arith.constant 0 : i32
    %c0_i32_1 = arith.constant 0 : i32
    return %c0_i32, %c0_i32_0 : i32, i32
  }
  func.func @transform_10(%arg0: i32) -> (i32, i32) {
    %c0_i32 = arith.constant 0 : i32
    %c0_i32_0 = arith.constant 0 : i32
    %c0_i32_1 = arith.constant 0 : i32
    return %c0_i32, %c0_i32_0 : i32, i32
  }
  func.func @transform_11(%arg0: i32) -> (i32, i32) {
    %c0_i32 = arith.constant 0 : i32
    %c0_i32_0 = arith.constant 0 : i32
    %c0_i32_1 = arith.constant 0 : i32
    return %c0_i32, %c0_i32_0 : i32, i32
  }
  func.func @transform_12(%arg0: i32) -> (i32, i32) {
    %c0_i32 = arith.constant 0 : i32
    %c0_i32_0 = arith.constant 0 : i32
    return %arg0, %c0_i32 : i32, i32
  }
  func.func @transform_13(%arg0: i32) -> (i32, i32) {
    %c0_i32 = arith.constant 0 : i32
    %c0_i32_0 = arith.constant 0 : i32
    return %arg0, %c0_i32 : i32, i32
  }
}

</mosaic_0001>

<bundles_post_ra>
// kernel: tpu_custom_call.1
= control target key start
LH: loop header
LB: loop body
LE: loop exit
PB: predicated region body
PF: predicated region fallthrough
CT: control target
= control target key end

     0   :  { %19 = vsyncpa [#allocation3], 0  ;;  %s1923_s0 = inlined_call_operand.hbm [shape: f32[16,128], index: 0, kind: input, shape index: {}]   ;;  %s1924_s1 = inlined_call_operand.hbm [shape: f32[16,128], index: 1, kind: input, shape index: {}]   ;;  %s1925_s2 = inlined_call_operand.hbm [shape: f32[16,128], index: 2, kind: input, shape index: {}]   ;;  %s1926_s3 = inlined_call_operand.hbm [shape: bf16[128,128], index: 3, kind: input, shape index: {}]   ;;  %s1927_s4 = inlined_call_operand.hbm [shape: bf16[256,128], index: 4, kind: input, shape index: {}]   ;;  %s1928_s5 = inlined_call_operand.vmem [shape: f32[1,128], index: 5, kind: input, shape index: {}]   ;;  %s1929_s6 = inlined_call_operand.hbm [shape: bf16[128,128], index: 6, kind: input, shape index: {}]   ;;  %s1930_s7 = inlined_call_operand.vmem [shape: f32[1,128], index: 7, kind: input, shape index: {}]   ;;  %s1931_s8 = inlined_call_operand.hbm [shape: bf16[256,128], index: 8, kind: input, shape index: {}]   ;;  %s1932_s9 = inlined_call_operand.vmem [shape: f32[1,128], index: 9, kind: input, shape index: {}]   ;;  %s1933_s10 = inlined_call_operand.hbm [shape: bf16[128,128], index: 10, kind: input, shape index: {}]   ;;  %s1934_s11 = inlined_call_operand.vmem [shape: f32[1,128], index: 11, kind: input, shape index: {}]   ;;  %s1935_s12 = inlined_call_operand.hbm [shape: f32[16,128], index: 12, kind: output, shape index: {0}]   ;;  %s1936_s13 = inlined_call_operand.vmem [shape: f32[16,1], index: 13, kind: output, shape index: {1}]  }
   0x1   :  { %20 = vsyncpa [#allocation6], 0 }
   0x2   :  { %21 = vsyncpa [#allocation9], 0 }
   0x3   :  { %22 = vsyncpa [#allocation12], 0 }
   0x4   :  { %23 = vsyncpa [#allocation15], 0 }
   0x5   :  { %24 = vsyncpa [#allocation4], 0  ;;  %s1605_s25 = smov [#allocation5]   ;;  %s1606_s27 = smov [#allocation8]  }
   0x6   :  { %s42_s26 = sshll.u32 %s1605_s25, 4  ;;  %s66_s28 = sshll.u32 %s1606_s27, 4  ;;  %s43_s26 = int_to_ptr.vmem [resolvable:$true] %s42_s26  ;;  %s1690_s28 = int_to_ptr.vmem [resolvable:$true] %s66_s28 }
   0x7   :  { %s1395_s14 = scalar_lea.hbm %s1924_s1, 256 }
   0x8   :  { %p1396_p0 = scmp.ne.s32.totalorder %s1924_s1, %s1395_s14  ;;  %p1399_p1 = scmp.lt.u32.totalorder %s1395_s14, %s1924_s1 }
   0xa   :  { %p1401_p2 = pnand %p1399_p1, %p1396_p0 }
   0xc   :  { %1404 = shalt.err (!%p1401_p2)
}
   0xd   :  { %s1405_s19 = scalar_lea.vmem %s43_s26, 256  ;;  %p1410_p4 = scmp.lt.s32.totalorder %s43_s26, %s43_s26 }
   0xe   :  { %p1406_p3 = scmp.ne.s32.totalorder %s43_s26, %s1405_s19  ;;  %p1411_p5 = scmp.lt.s32.totalorder %s1405_s19, %s1405_s19 }
  0x10   :  { %p1412_p6 = por %p1411_p5, %p1410_p4 }
  0x12   :  { %p1413_p7 = pnand %p1412_p6, %p1406_p3 }
  0x14   :  { %1416 = shalt.err (!%p1413_p7)
}
  0x15   :  { %s1607_s20 = smov 128   ;;  %s1608_s21 = smov 8  }
  0x16   :  { %48 = dma.hbm_to_vmem [thread:$0]  %s1924_s1, 256, %s43_s26, [#allocation6], %s1607_s20, %s1607_s20, %s1608_s21  }
  0x17   :  { %s1417_s27 = scalar_lea.hbm %s1926_s3, 1024 }
  0x18   :  { %p1418_p8 = scmp.ne.s32.totalorder %s1926_s3, %s1417_s27  ;;  %p1421_p9 = scmp.lt.u32.totalorder %s1417_s27, %s1926_s3 }
  0x1a   :  { %p1423_p10 = pnand %p1421_p9, %p1418_p8 }
  0x1c   :  { %1426 = shalt.err (!%p1423_p10)
}
  0x1d   :  { %s1427_s16 = scalar_lea.vmem %s1690_s28, 1024  ;;  %p1432_p12 = scmp.lt.s32.totalorder %s1690_s28, %s1690_s28 }
  0x1e   :  { %p1428_p11 = scmp.ne.s32.totalorder %s1690_s28, %s1427_s16  ;;  %p1433_p13 = scmp.lt.s32.totalorder %s1427_s16, %s1427_s16 }
  0x20   :  { %p1434_p0 = por %p1433_p13, %p1432_p12 }
  0x22   :  { %p1435_p1 = pnand %p1434_p0, %p1428_p11 }
  0x24   :  { %1438 = shalt.err (!%p1435_p1)
}
  0x25   :  { %s1609_s1 = smov 64   ;;  %s1610_s26 = smov 4  }
  0x26   :  { %72 = dma.hbm_to_vmem [thread:$0]  %s1926_s3, 1024, %s1690_s28, [#allocation9], %s1609_s1, %s1609_s1, %s1610_s26  }
  0x27   :  { %s1611_s19 = smov [#allocation11]   ;;  %s1612_s23 = smov [#allocation2]  }
  0x28   :  { %s92_s22 = sshll.u32 %s1611_s19, 4  ;;  %s30_s24 = sshll.u32 %s1612_s23, 4  ;;  %s93_s22 = int_to_ptr.vmem [resolvable:$true] %s92_s22  ;;  %s1727_s24 = int_to_ptr.vmem [resolvable:$true] %s30_s24 }
  0x29   :  { %s1439_s29 = scalar_lea.hbm %s1929_s6, 1024 }
  0x2a   :  { %p1440_p2 = scmp.ne.s32.totalorder %s1929_s6, %s1439_s29  ;;  %p1443_p3 = scmp.lt.u32.totalorder %s1439_s29, %s1929_s6 }
  0x2c   :  { %p1445_p4 = pnand %p1443_p3, %p1440_p2 }
  0x2e   :  { %1448 = shalt.err (!%p1445_p4)
}
  0x2f   :  { %s1449_s3 = scalar_lea.vmem %s93_s22, 1024  ;;  %p1454_p6 = scmp.lt.s32.totalorder %s93_s22, %s93_s22 }
  0x30   :  { %p1450_p5 = scmp.ne.s32.totalorder %s93_s22, %s1449_s3  ;;  %p1455_p7 = scmp.lt.s32.totalorder %s1449_s3, %s1449_s3 }
  0x32   :  { %p1456_p8 = por %p1455_p7, %p1454_p6 }
  0x34   :  { %p1457_p9 = pnand %p1456_p8, %p1450_p5 }
  0x36   :  { %1460 = shalt.err (!%p1457_p9)
}
  0x37   :  { %98 = dma.hbm_to_vmem [thread:$0]  %s1929_s6, 1024, %s93_s22, [#allocation12], %s1609_s1, %s1609_s1, %s1610_s26  }
  0x38   :  { %s1461_s23 = scalar_lea.hbm %s1923_s0, 256 }
  0x39   :  { %p1462_p10 = scmp.ne.s32.totalorder %s1923_s0, %s1461_s23  ;;  %p1465_p11 = scmp.lt.u32.totalorder %s1461_s23, %s1923_s0 }
  0x3b   :  { %p1467_p12 = pnand %p1465_p11, %p1462_p10 }
  0x3d   :  { %1470 = shalt.err (!%p1467_p12)
}
  0x3e   :  { %s1471_s14 = scalar_lea.vmem %s1727_s24, 256  ;;  %p1476_p0 = scmp.lt.s32.totalorder %s1727_s24, %s1727_s24 }
  0x3f   :  { %p1472_p13 = scmp.ne.s32.totalorder %s1727_s24, %s1471_s14  ;;  %p1477_p1 = scmp.lt.s32.totalorder %s1471_s14, %s1471_s14 }
  0x41   :  { %p1478_p2 = por %p1477_p1, %p1476_p0 }
  0x43   :  { %p1479_p3 = pnand %p1478_p2, %p1472_p13 }
  0x45   :  { %1482 = shalt.err (!%p1479_p3)
}
  0x46   :  { %36 = dma.hbm_to_vmem [thread:$0]  %s1923_s0, 256, %s1727_s24, [#allocation3], %s1607_s20, %s1607_s20, %s1608_s21  }
  0x47   :  { %s1613_s15 = smov [#allocation7]   ;;  %s1614_s3 = smov [#allocation10]  }
  0x48   :  { %s54_s16 = sshll.u32 %s1613_s15, 4  ;;  %s78_s28 = sshll.u32 %s1614_s3, 4  ;;  %s55_s16 = int_to_ptr.vmem [resolvable:$true] %s54_s16  ;;  %s1764_s28 = int_to_ptr.vmem [resolvable:$true] %s78_s28 }
  0x49   :  { %s1483_s19 = scalar_lea.hbm %s1925_s2, 256 }
  0x4a   :  { %p1484_p4 = scmp.ne.s32.totalorder %s1925_s2, %s1483_s19  ;;  %p1487_p5 = scmp.lt.u32.totalorder %s1483_s19, %s1925_s2 }
  0x4c   :  { %p1489_p6 = pnand %p1487_p5, %p1484_p4 }
  0x4e   :  { %1492 = shalt.err (!%p1489_p6)
}
  0x4f   :  { %s1493_s0 = scalar_lea.vmem %s55_s16, 256  ;;  %p1498_p8 = scmp.lt.s32.totalorder %s55_s16, %s55_s16 }
  0x50   :  { %p1494_p7 = scmp.ne.s32.totalorder %s55_s16, %s1493_s0  ;;  %p1499_p9 = scmp.lt.s32.totalorder %s1493_s0, %s1493_s0 }
  0x52   :  { %p1500_p10 = por %p1499_p9, %p1498_p8 }
  0x54   :  { %p1501_p11 = pnand %p1500_p10, %p1494_p7 }
  0x56   :  { %1504 = shalt.err (!%p1501_p11)
}
  0x57   :  { %60 = dma.hbm_to_vmem [thread:$0]  %s1925_s2, 256, %s55_s16, [#allocation6], %s1607_s20, %s1607_s20, %s1608_s21  }
  0x58   :  { %s1505_s22 = scalar_lea.hbm %s1927_s4, 2048 }
  0x59   :  { %p1506_p12 = scmp.ne.s32.totalorder %s1927_s4, %s1505_s22  ;;  %p1509_p13 = scmp.lt.u32.totalorder %s1505_s22, %s1927_s4 }
  0x5b   :  { %p1511_p0 = pnand %p1509_p13, %p1506_p12 }
  0x5d   :  { %1514 = shalt.err (!%p1511_p0)
}
  0x5e   :  { %s1515_s19 = scalar_lea.vmem %s1764_s28, 2048  ;;  %p1520_p2 = scmp.lt.s32.totalorder %s1764_s28, %s1764_s28 }
  0x5f   :  { %p1516_p1 = scmp.ne.s32.totalorder %s1764_s28, %s1515_s19  ;;  %p1521_p3 = scmp.lt.s32.totalorder %s1515_s19, %s1515_s19 }
  0x61   :  { %p1522_p4 = por %p1521_p3, %p1520_p2 }
  0x63   :  { %p1523_p5 = pnand %p1522_p4, %p1516_p1 }
  0x65   :  { %1526 = shalt.err (!%p1523_p5)
}
  0x66   :  { %84 = dma.hbm_to_vmem [thread:$0]  %s1927_s4, 2048, %s1764_s28, [#allocation9], %s1609_s1, %s1609_s1, %s1610_s26  }
  0x67   :  { %s1615_s23 = smov [#allocation13]   ;;  %s1616_s27 = smov [#allocation14]  }
  0x68   :  { %s106_s25 = sshll.u32 %s1615_s23, 4  ;;  %s120_s29 = sshll.u32 %s1616_s27, 4  ;;  %s107_s25 = int_to_ptr.vmem [resolvable:$true] %s106_s25  ;;  %s1801_s29 = int_to_ptr.vmem [resolvable:$true] %s120_s29 }
  0x69   :  { %s1527_s30 = scalar_lea.hbm %s1931_s8, 2048 }
  0x6a   :  { %p1528_p6 = scmp.ne.s32.totalorder %s1931_s8, %s1527_s30  ;;  %p1531_p7 = scmp.lt.u32.totalorder %s1527_s30, %s1931_s8 }
  0x6c   :  { %p1533_p8 = pnand %p1531_p7, %p1528_p6 }
  0x6e   :  { %1536 = shalt.err (!%p1533_p8)
}
  0x6f   :  { %s1537_s4 = scalar_lea.vmem %s107_s25, 2048  ;;  %p1542_p10 = scmp.lt.s32.totalorder %s107_s25, %s107_s25 }
  0x70   :  { %p1538_p9 = scmp.ne.s32.totalorder %s107_s25, %s1537_s4  ;;  %p1543_p11 = scmp.lt.s32.totalorder %s1537_s4, %s1537_s4 }
  0x72   :  { %p1544_p12 = por %p1543_p11, %p1542_p10 }
  0x74   :  { %p1545_p13 = pnand %p1544_p12, %p1538_p9 }
  0x76   :  { %1548 = shalt.err (!%p1545_p13)
}
  0x77   :  { %112 = dma.hbm_to_vmem [thread:$0]  %s1931_s8, 2048, %s107_s25, [#allocation12], %s1609_s1, %s1609_s1, %s1610_s26  }
  0x78   :  { %s1549_s19 = scalar_lea.hbm %s1933_s10, 1024 }
  0x79   :  { %p1550_p0 = scmp.ne.s32.totalorder %s1933_s10, %s1549_s19  ;;  %p1553_p1 = scmp.lt.u32.totalorder %s1549_s19, %s1933_s10 }
  0x7b   :  { %p1555_p2 = pnand %p1553_p1, %p1550_p0 }
  0x7d   :  { %1558 = shalt.err (!%p1555_p2)
}
  0x7e   :  { %s1559_s0 = scalar_lea.vmem %s1801_s29, 1024  ;;  %p1564_p4 = scmp.lt.s32.totalorder %s1801_s29, %s1801_s29 }
  0x7f   :  { %p1560_p3 = scmp.ne.s32.totalorder %s1801_s29, %s1559_s0  ;;  %p1565_p5 = scmp.lt.s32.totalorder %s1559_s0, %s1559_s0 }
  0x81   :  { %p1566_p6 = por %p1565_p5, %p1564_p4 }
  0x83   :  { %p1567_p7 = pnand %p1566_p6, %p1560_p3 }
  0x85   :  { %1570 = shalt.err (!%p1567_p7)
}
  0x86   :  { %126 = dma.hbm_to_vmem [thread:$0]  %s1933_s10, 1024, %s1801_s29, [#allocation15], %s1609_s1, %s1609_s1, %s1610_s26  }
  0x87   :  { %1593 = dma.done.wait [#allocation3], 256  }
  0x88   :  { %1594 = vsyncadd [#allocation3], 4294967040 }
  0x89   :  { %1595 = dma.done.wait [#allocation6], 512  }
  0x8a   :  { %1596 = vsyncadd [#allocation6], 4294966784 }
  0x8b   :  { %1597 = dma.done.wait [#allocation9], 3072  }
  0x8c   :  { %1598 = vsyncadd [#allocation9], 4294964224 }
  0x8d   :  { %1599 = dma.done.wait [#allocation12], 3072  }
  0x8e   :  { %1600 = vsyncadd [#allocation12], 4294964224 }
  0x8f   :  { %1601 = dma.done.wait [#allocation15], 1024  }
  0x90   :  { %1602 = vsyncadd [#allocation15], 4294966272  ;;  %v1617_v0 = vmov 0.0   ;;  %vm1618_vm0 = vmmov 0   ;;  %v1303_v1 = vld [vmem:[#allocation8] sm:$0xff]   ;;  %v1304_v2 = vld [vmem:[#allocation8 + $0x8] sm:$0xff]  }
  0x91   :  { %1208 = vmatprep.subr.bf16.mxu0 %v1617_v0  ;;  %1228 = vmatprep.subr.bf16.mxu1 %v1617_v0  ;;  %v1305_v3 = vld [vmem:[#allocation8 + $0x10] sm:$0xff]   ;;  %v1306_v4 = vld [vmem:[#allocation8 + $0x18] sm:$0xff]   ;;  %v1307_v5 = vld [vmem:[#allocation8 + $0x20] sm:$0xff]  }
  0x92   :  { %1224 = vmatprep.mubr.msk.bf16.mxu0 %vm1618_vm0, %v1617_v0  ;;  %1244 = vmatprep.mubr.msk.bf16.mxu1 %vm1618_vm0, %v1617_v0  ;;  %v1308_v6 = vld [vmem:[#allocation8 + $0x28] sm:$0xff]   ;;  %v1309_v7 = vld [vmem:[#allocation8 + $0x30] sm:$0xff]   ;;  %v1310_v8 = vld [vmem:[#allocation8 + $0x38] sm:$0xff]  }
  0x93   :  { %1209 = vmatpush3.bf16.msra.mxu0 %v1303_v1  ;;  %1229 = vmatpush3.bf16.msra.mxu1 %v1303_v1  ;;  %v154_v9 = vld [vmem:[#allocation5] sm:$0xff]  ;;  %v155_v10 = vld [vmem:[#allocation5 + $0x8] sm:$0xff]  ;;  %v157_v11 = vld [vmem:[#allocation7] sm:$0xff] }
  0x94   :  { %1210 = vmatprep.subr.bf16.mxu0 %v1617_v0  ;;  %1230 = vmatprep.subr.bf16.mxu1 %v1617_v0  ;;  %v158_v12 = vld [vmem:[#allocation7 + $0x8] sm:$0xff]  ;;  %v1311_v13 = vld [vmem:[#allocation10 + $0x40] sm:$0xff]   ;;  %v156_v15 = vpack.c.bf16 %v155_v10, %v154_v9  ;;  %v1313_v17 = vld [vmem:[#allocation10 + $0x48] sm:$0xff]  }
  0x95   :  { %v1312_v14 = vld [vmem:[#allocation10] sm:$0xff]   ;;  %v159_v16 = vpack.c.bf16 %v158_v12, %v157_v11  ;;  %v1314_v18 = vld [vmem:[#allocation10 + $0x8] sm:$0xff]   ;;  %v1315_v19 = vld [vmem:[#allocation10 + $0x50] sm:$0xff]  }
  0x96   :  { %v1316_v20 = vld [vmem:[#allocation10 + $0x10] sm:$0xff]   ;;  %v1317_v21 = vld [vmem:[#allocation10 + $0x58] sm:$0xff]   ;;  %v1319_v23 = vld [vmem:[#allocation10 + $0x60] sm:$0xff]  }
  0x97   :  { %1211 = vmatpush3.bf16.msra.mxu0 %v1304_v2  ;;  %1231 = vmatpush3.bf16.msra.mxu1 %v1304_v2  ;;  %v1318_v22 = vld [vmem:[#allocation10 + $0x18] sm:$0xff]   ;;  %v1320_v24 = vld [vmem:[#allocation10 + $0x20] sm:$0xff]   ;;  %v1321_v25 = vld [vmem:[#allocation10 + $0x68] sm:$0xff]  }
  0x98   :  { %1212 = vmatprep.subr.bf16.mxu0 %v1617_v0  ;;  %1232 = vmatprep.subr.bf16.mxu1 %v1617_v0  ;;  %v1322_v26 = vld [vmem:[#allocation10 + $0x28] sm:$0xff]   ;;  %v1323_v27 = vld [vmem:[#allocation10 + $0x70] sm:$0xff]   ;;  %v1325_v29 = vld [vmem:[#allocation10 + $0x78] sm:$0xff]  }
  0x99   :  { %v1324_v28 = vld [vmem:[#allocation10 + $0x30] sm:$0xff]   ;;  %v1326_v30 = vld [vmem:[#allocation10 + $0x38] sm:$0xff]   ;;  %v1327_v31 = vld [vmem:[#allocation13 + $0x40] sm:$0xff]  }
  0x9a   :  { %v1328_v46 = vld [vmem:[#allocation13] sm:$0xff]   ;;  %v1329_v47 = vld [vmem:[#allocation13 + $0x48] sm:$0xff]   ;;  %v1331_v49 = vld [vmem:[#allocation13 + $0x50] sm:$0xff]  }
  0x9b   :  { %1213 = vmatpush3.bf16.msra.mxu0 %v1305_v3  ;;  %1233 = vmatpush3.bf16.msra.mxu1 %v1305_v3  ;;  %v1330_v48 = vld [vmem:[#allocation13 + $0x8] sm:$0xff]   ;;  %v1332_v50 = vld [vmem:[#allocation13 + $0x10] sm:$0xff]   ;;  %v1333_v51 = vld [vmem:[#allocation13 + $0x58] sm:$0xff]  }
  0x9c   :  { %1214 = vmatprep.subr.bf16.mxu0 %v1617_v0  ;;  %1234 = vmatprep.subr.bf16.mxu1 %v1617_v0  ;;  %v1334_v52 = vld [vmem:[#allocation13 + $0x18] sm:$0xff]   ;;  %v1335_v53 = vld [vmem:[#allocation13 + $0x60] sm:$0xff]   ;;  %v1337_v55 = vld [vmem:[#allocation13 + $0x68] sm:$0xff]  }
  0x9d   :  { %v1336_v54 = vld [vmem:[#allocation13 + $0x20] sm:$0xff]   ;;  %v1338_v56 = vld [vmem:[#allocation13 + $0x28] sm:$0xff]   ;;  %v1339_v57 = vld [vmem:[#allocation13 + $0x70] sm:$0xff]  }
  0x9e   :  { %v1340_v58 = vld [vmem:[#allocation13 + $0x30] sm:$0xff]   ;;  %v1341_v59 = vld [vmem:[#allocation13 + $0x78] sm:$0xff]   ;;  %v1343_v61 = vld [vmem:[#allocation11] sm:$0xff]  }
  0x9f   :  { %1215 = vmatpush3.bf16.msra.mxu0 %v1306_v4  ;;  %1235 = vmatpush3.bf16.msra.mxu1 %v1306_v4  ;;  %v1342_v60 = vld [vmem:[#allocation13 + $0x38] sm:$0xff]   ;;  %v1344_v62 = vld [vmem:[#allocation11 + $0x8] sm:$0xff]   ;;  %v1345_v63 = vld [vmem:[#allocation11 + $0x10] sm:$0xff]  }
  0xa0   :  { %1216 = vmatprep.subr.bf16.mxu0 %v1617_v0  ;;  %1236 = vmatprep.subr.bf16.mxu1 %v1617_v0  ;;  %v1346_v1 = vld [vmem:[#allocation11 + $0x18] sm:$0xff]   ;;  %v1347_v2 = vld [vmem:[#allocation11 + $0x20] sm:$0xff]   ;;  %v1348_v3 = vld [vmem:[#allocation11 + $0x28] sm:$0xff]  }
  0xa1   :  { %v1349_v4 = vld [vmem:[#allocation11 + $0x30] sm:$0xff]  }
  0xa3   :  { %1217 = vmatpush3.bf16.msra.mxu0 %v1307_v5  ;;  %1237 = vmatpush3.bf16.msra.mxu1 %v1307_v5  ;;  %v1350_v5 = vld [vmem:[#allocation11 + $0x38] sm:$0xff]  }
  0xa4   :  { %1218 = vmatprep.subr.bf16.mxu0 %v1617_v0  ;;  %1238 = vmatprep.subr.bf16.mxu1 %v1617_v0 }
  0xa7   :  { %1219 = vmatpush3.bf16.msra.mxu0 %v1308_v6  ;;  %1239 = vmatpush3.bf16.msra.mxu1 %v1308_v6 }
  0xa8   :  { %1220 = vmatprep.subr.bf16.mxu0 %v1617_v0  ;;  %1240 = vmatprep.subr.bf16.mxu1 %v1617_v0 }
  0xab   :  { %1221 = vmatpush3.bf16.msra.mxu0 %v1309_v7  ;;  %1241 = vmatpush3.bf16.msra.mxu1 %v1309_v7  ;;  %v1076_v7 = vld [vmem:[%s1928_s5] ss:$0 sm:$0xff] }
  0xac   :  { %1222 = vmatprep.subr.bf16.mxu0 %v1617_v0  ;;  %1242 = vmatprep.subr.bf16.mxu1 %v1617_v0 }
  0xaf   :  { %1223 = vmatpush3.bf16.msra.mxu0 %v1310_v8  ;;  %1243 = vmatpush3.bf16.msra.mxu1 %v1310_v8 }
  0xb0   :  { %1146 = vmatprep.subr.bf16.mxu0 %v1311_v13  ;;  %1248 = vmatprep.subr.bf16.mxu1 %v1617_v0 }
  0xb2   :  { %1225 = vmatmul.mubr.bf16.vlgmr.msra.gmra.mrb[0].mxu0 %v156_v15  ;;  %1245 = vmatmul.mubr.bf16.vlgmr.msra.gmra.mrb[0].mxu1 %v159_v16 }
  0xb3   :  { %1147 = vmatpush3.bf16.msra.mxu0 %v1312_v14  ;;  %1264 = vmatprep.mubr.msk.bf16.mxu1 %vm1618_vm0, %v1617_v0 }
  0xb4   :  { %1148 = vmatprep.subr.bf16.mxu0 %v1313_v17  ;;  %1249 = vmatpush3.bf16.msra.mxu1 %v1343_v61  ;;  %v1353_v61 = vld [vmem:[#allocation14 + $0x10] sm:$0xff]  }
  0xb5   :  { %1250 = vmatprep.subr.bf16.mxu1 %v1617_v0 }
  0xb7   :  { %1149 = vmatpush3.bf16.msra.mxu0 %v1314_v18 }
  0xb8   :  { %1150 = vmatprep.subr.bf16.mxu0 %v1315_v19  ;;  %1251 = vmatpush3.bf16.msra.mxu1 %v1344_v62 }
  0xb9   :  { %1252 = vmatprep.subr.bf16.mxu1 %v1617_v0 }
  0xbb   :  { %1151 = vmatpush3.bf16.msra.mxu0 %v1316_v20 }
  0xbc   :  { %1152 = vmatprep.subr.bf16.mxu0 %v1317_v21  ;;  %1253 = vmatpush3.bf16.msra.mxu1 %v1345_v63  ;;  %v1354_v63 = vld [vmem:[#allocation14 + $0x18] sm:$0xff]  }
  0xbd   :  { %1254 = vmatprep.subr.bf16.mxu1 %v1617_v0 }
  0xbf   :  { %1153 = vmatpush3.bf16.msra.mxu0 %v1318_v22 }
  0xc0   :  { %1154 = vmatprep.subr.bf16.mxu0 %v1319_v23  ;;  %1255 = vmatpush3.bf16.msra.mxu1 %v1346_v1 }
  0xc1   :  { %1256 = vmatprep.subr.bf16.mxu1 %v1617_v0 }
  0xc3   :  { %1155 = vmatpush3.bf16.msra.mxu0 %v1320_v24 }
  0xc4   :  { %1156 = vmatprep.subr.bf16.mxu0 %v1321_v25  ;;  %1257 = vmatpush3.bf16.msra.mxu1 %v1347_v2 }
  0xc5   :  { %1258 = vmatprep.subr.bf16.mxu1 %v1617_v0 }
  0xc7   :  { %1157 = vmatpush3.bf16.msra.mxu0 %v1322_v26 }
  0xc8   :  { %1158 = vmatprep.subr.bf16.mxu0 %v1323_v27  ;;  %1259 = vmatpush3.bf16.msra.mxu1 %v1348_v3 }
  0xc9   :  { %1260 = vmatprep.subr.bf16.mxu1 %v1617_v0 }
  0xcb   :  { %1159 = vmatpush3.bf16.msra.mxu0 %v1324_v28 }
  0xcc   :  { %1160 = vmatprep.subr.bf16.mxu0 %v1325_v29  ;;  %1261 = vmatpush3.bf16.msra.mxu1 %v1349_v4  ;;  %v1355_v4 = vld [vmem:[#allocation14 + $0x20] sm:$0xff]  }
  0xcd   :  { %1262 = vmatprep.subr.bf16.mxu1 %v1617_v0 }
  0xcf   :  { %1161 = vmatpush3.bf16.msra.mxu0 %v1326_v30  ;;  %v1102_v30 = vld [vmem:[%s1932_s9] ss:$0 sm:$0xff] }
  0xd0   :  { %1177 = vmatprep.subr.bf16.mxu0 %v1327_v31  ;;  %1263 = vmatpush3.bf16.msra.mxu1 %v1350_v5 }
  0xd1   :  { %1268 = vmatprep.subr.bf16.mxu1 %v1617_v0 }
 0x185   :  { %v258_v32 = vpop.f32.mrb[0].mxu0  ;;  %v299_v33 = vpop.f32.mrb[0].mxu1 }
 0x186   :  { %v306_v34 = vmul.f32 %v299_v33, %v258_v32  ;;  %v309_v35 = vadd.f32 %v299_v33, %v258_v32  ;;  %v1226_v36 = vpop.f32.mrb[1].mxu0  ;;  %v1246_v37 = vpop.f32.mrb[1].mxu1 }
 0x187   :  { %v261_v38 = vpop.f32.mrb[2].mxu0  ;;  %v302_v39 = vpop.f32.mrb[2].mxu1 }
 0x188   :  { %v307_v40 = vmul.f32 %v302_v39, %v261_v38  ;;  %v310_v41 = vadd.f32 %v302_v39, %v261_v38  ;;  %v1227_v42 = vpop.f32.mrb[3].mxu0  ;;  %v1247_v43 = vpop.f32.mrb[3].mxu1 }
 0x18a   :  { %v308_v44 = vpack.c.bf16 %v307_v40, %v306_v34  ;;  %v311_v45 = vpack.c.bf16 %v310_v41, %v309_v35 }
 0x18c   :  { %479 = vmatprep.mubr.bf16.mxu0 %v311_v45 }
 0x18d   :  { %480 = vmatmul.mubr.bf16.vlgmr.msra.gmra.mrb[4].mxu0 %v308_v44 }
 0x18e   :  { %1178 = vmatpush3.bf16.msra.mxu0 %v1328_v46  ;;  %828 = vmatprep.mubr.bf16.mxu0 %v311_v45 }
 0x18f   :  { %1179 = vmatprep.subr.bf16.mxu0 %v1329_v47 }
 0x192   :  { %1180 = vmatpush3.bf16.msra.mxu0 %v1330_v48 }
 0x193   :  { %1181 = vmatprep.subr.bf16.mxu0 %v1331_v49 }
 0x196   :  { %1182 = vmatpush3.bf16.msra.mxu0 %v1332_v50 }
 0x197   :  { %1183 = vmatprep.subr.bf16.mxu0 %v1333_v51 }
 0x19a   :  { %1184 = vmatpush3.bf16.msra.mxu0 %v1334_v52 }
 0x19b   :  { %1185 = vmatprep.subr.bf16.mxu0 %v1335_v53 }
 0x19e   :  { %1186 = vmatpush3.bf16.msra.mxu0 %v1336_v54 }
 0x19f   :  { %1187 = vmatprep.subr.bf16.mxu0 %v1337_v55 }
 0x1a2   :  { %1188 = vmatpush3.bf16.msra.mxu0 %v1338_v56  ;;  %v1351_v56 = vld [vmem:[#allocation14] sm:$0xff]  }
 0x1a3   :  { %1189 = vmatprep.subr.bf16.mxu0 %v1339_v57 }
 0x1a6   :  { %1190 = vmatpush3.bf16.msra.mxu0 %v1340_v58 }
 0x1a7   :  { %1191 = vmatprep.subr.bf16.mxu0 %v1341_v59 }
 0x1aa   :  { %1192 = vmatpush3.bf16.msra.mxu0 %v1342_v60  ;;  %v1352_v60 = vld [vmem:[#allocation14 + $0x8] sm:$0xff]  }
 0x1ad   :  { %829 = vmatmul.mubr.bf16.vlgmr.msra.gmra.mrb[8].mxu0 %v308_v44 }
 0x260   :  { %v1162_v6 = vpop.f32.mrb[4].mxu0 }
 0x261   :  { %v1163_v8 = vpop.f32.mrb[5].mxu0 }
 0x262   :  { %v1164_v9 = vadd.f32 %v1163_v8, %v1162_v6  ;;  %v1165_v10 = vpop.f32.mrb[6].mxu0  ;;  %v1356_v6 = vld [vmem:[#allocation14 + $0x28] sm:$0xff]  }
 0x263   :  { %v1166_v11 = vpop.f32.mrb[7].mxu0 }
 0x264   :  { %v482_v12 = vadd.f32 %v1164_v9, %v1076_v7  ;;  %v1167_v13 = vadd.f32 %v1166_v11, %v1165_v10  ;;  %v1357_v10 = vld [vmem:[#allocation14 + $0x30] sm:$0xff]  }
 0x266   :  { %v490_v14 = vand.u32 2147483647, %v482_v12  ;;  %v485_v15 = vadd.f32 %v1167_v13, %v1076_v7  ;;  %v488_v47 = vmax.f32 %v482_v12, 0.0 }
 0x268   :  { %v492_v16 = vsub.f32 0.0, %v490_v14  ;;  %v491_v17 = vand.u32 2147483647, %v485_v15  ;;  %v489_v48 = vmax.f32 %v485_v15, 0.0 }
 0x26a   :  { %v494_v18 = vmul.f32 1.442695, %v492_v16  ;;  %v493_v19 = vsub.f32 0.0, %v491_v17  ;;  %v1358_v17 = vld [vmem:[#allocation14 + $0x38] sm:$0xff]  }
 0x26c   :  { %1359 = vpow2.f32 %v494_v18  ;;  %v496_v20 = vmul.f32 1.442695, %v493_v19 }
 0x26e   :  { %1361 = vpow2.f32 %v496_v20 }
 0x276   :  { %v1360_v21 = vpop.eup %1359 }
 0x277   :  { %v498_v22 = vadd.f32 1.0, %v1360_v21  ;;  %v501_v25 = vmul.f32 -0.5, %v1360_v21  ;;  %v504_v29 = vand.u32 2147483647, %v1360_v21 }
 0x278   :  { %v1362_v23 = vpop.eup %1361 }
 0x279   :  { %1363 = vlog2.f32 %v498_v22  ;;  %v507_v24 = vadd.f32 1.0, %v1362_v23  ;;  %v510_v26 = vmul.f32 -0.5, %v1362_v23  ;;  %v502_v27 = vadd.f32 1.0, %v501_v25 }
 0x27a   :  { %v513_v36 = vand.u32 2147483647, %v1362_v23  ;;  %vm505_vm1 = vcmp.lt.f32.partialorder %v504_v29, 0.0004427343 }
 0x27b   :  { %1365 = vlog2.f32 %v507_v24  ;;  %v511_v32 = vadd.f32 1.0, %v510_v26  ;;  %v503_v39 = vmul.f32 %v1360_v21, %v502_v27 }
 0x27c   :  { %vm514_vm2 = vcmp.lt.f32.partialorder %v513_v36, 0.0004427343 }
 0x27d   :  { %v512_v45 = vmul.f32 %v1362_v23, %v511_v32 }
 0x280   :  { %v1193_v28 = vpop.f32.mrb[8].mxu0 }
 0x281   :  { %v1194_v31 = vpop.f32.mrb[9].mxu0 }
 0x282   :  { %v1195_v33 = vadd.f32 %v1194_v31, %v1193_v28  ;;  %v1196_v34 = vpop.f32.mrb[10].mxu0  ;;  %v1093_v31 = vld [vmem:[%s1930_s7] ss:$0 sm:$0xff]  ;;  %s1619_s7 = smov [#allocation16]  }
 0x283   :  { %v1364_v35 = vpop.eup %1363  ;;  %v1197_v37 = vpop.f32.mrb[11].mxu0 }
 0x284   :  { %v500_v38 = vmul.f32 0.6931472, %v1364_v35  ;;  %v1875_v40 = vadd.f32 %v1195_v33, %v1102_v30  ;;  %v1198_v41 = vadd.f32 %v1197_v37, %v1196_v34 }
 0x285   :  { %v1366_v42 = vpop.eup %1365 }
 0x286   :  { %v506_v43 = vsel %vm505_vm1, %v503_v39, %v500_v38  ;;  %v509_v44 = vmul.f32 0.6931472, %v1366_v42  ;;  %v839_v46 = vand.u32 2147483647, %v1875_v40  ;;  %v834_v49 = vadd.f32 %v1198_v41, %v1102_v30  ;;  %v1119_v39 = vld [vmem:[%s1934_s11] ss:$0 sm:$0xff] }
 0x287   :  { %v516_v52 = vadd.f32 %v506_v43, %v488_v47  ;;  %v837_v21 = vmax.f32 %v1875_v40, 0.0  ;;  %s1048_s11 = sshll.u32 %s1619_s7, 4  ;;  %s1049_s11 = int_to_ptr.vmem [resolvable:$true] %s1048_s11 }
 0x288   :  { %v515_v50 = vsel %vm514_vm2, %v512_v45, %v509_v44  ;;  %v841_v51 = vsub.f32 0.0, %v839_v46  ;;  %v840_v54 = vand.u32 2147483647, %v834_v49  ;;  %v838_v22 = vmax.f32 %v834_v49, 0.0  ;;  %s1571_s14 = scalar_lea.vmem %s1049_s11, 256  ;;  %p1576_p9 = scmp.lt.s32.totalorder %s1049_s11, %s1049_s11 }
 0x289   :  { %v517_v53 = vadd.f32 %v515_v50, %v489_v48  ;;  %p1572_p8 = scmp.ne.s32.totalorder %s1049_s11, %s1571_s14  ;;  %p1577_p10 = scmp.lt.s32.totalorder %s1571_s14, %s1571_s14 }
 0x28a   :  { %v843_v55 = vmul.f32 1.442695, %v841_v51  ;;  %v842_v57 = vsub.f32 0.0, %v840_v54 }
 0x28b   :  { %v518_v58 = vpack.c.bf16 %v517_v53, %v516_v52  ;;  %p1578_p11 = por %p1577_p10, %p1576_p9 }
 0x28c   :  { %1367 = vpow2.f32 %v843_v55  ;;  %v845_v59 = vmul.f32 1.442695, %v842_v57 }
 0x28d   :  { %1265 = vmatmul.mubr.bf16.vlgmr.msra.gmra.mrb[4].mxu1 %v518_v58  ;;  %p1579_p12 = pnand %p1578_p11, %p1572_p8 }
 0x28e   :  { %1269 = vmatpush3.bf16.msra.mxu1 %v1351_v56  ;;  %1284 = vmatprep.mubr.msk.bf16.mxu1 %vm1618_vm0, %v1617_v0  ;;  %1369 = vpow2.f32 %v845_v59 }
 0x28f   :  { %1270 = vmatprep.subr.bf16.mxu1 %v1617_v0 }
 0x292   :  { %1271 = vmatpush3.bf16.msra.mxu1 %v1352_v60 }
 0x293   :  { %1272 = vmatprep.subr.bf16.mxu1 %v1617_v0 }
 0x296   :  { %v1368_v62 = vpop.eup %1367  ;;  %1273 = vmatpush3.bf16.msra.mxu1 %v1353_v61 }
 0x297   :  { %v847_v1 = vadd.f32 1.0, %v1368_v62  ;;  %1274 = vmatprep.subr.bf16.mxu1 %v1617_v0  ;;  %v850_v5 = vmul.f32 -0.5, %v1368_v62  ;;  %v853_v9 = vand.u32 2147483647, %v1368_v62 }
 0x298   :  { %v1370_v2 = vpop.eup %1369 }
 0x299   :  { %1371 = vlog2.f32 %v847_v1  ;;  %v856_v3 = vadd.f32 1.0, %v1370_v2  ;;  %v859_v7 = vmul.f32 -0.5, %v1370_v2  ;;  %v851_v8 = vadd.f32 1.0, %v850_v5 }
 0x29a   :  { %1275 = vmatpush3.bf16.msra.mxu1 %v1354_v63  ;;  %v862_v14 = vand.u32 2147483647, %v1370_v2  ;;  %vm854_vm3 = vcmp.lt.f32.partialorder %v853_v9, 0.0004427343 }
 0x29b   :  { %1276 = vmatprep.subr.bf16.mxu1 %v1617_v0  ;;  %1373 = vlog2.f32 %v856_v3  ;;  %v860_v12 = vadd.f32 1.0, %v859_v7  ;;  %v852_v15 = vmul.f32 %v1368_v62, %v851_v8 }
 0x29c   :  { %vm863_vm4 = vcmp.lt.f32.partialorder %v862_v14, 0.0004427343 }
 0x29d   :  { %v861_v20 = vmul.f32 %v1370_v2, %v860_v12 }
 0x29e   :  { %1277 = vmatpush3.bf16.msra.mxu1 %v1355_v4 }
 0x29f   :  { %1278 = vmatprep.subr.bf16.mxu1 %v1617_v0 }
 0x2a2   :  { %1279 = vmatpush3.bf16.msra.mxu1 %v1356_v6 }
 0x2a3   :  { %v1372_v11 = vpop.eup %1371  ;;  %1280 = vmatprep.subr.bf16.mxu1 %v1617_v0 }
 0x2a4   :  { %v849_v13 = vmul.f32 0.6931472, %v1372_v11 }
 0x2a5   :  { %v1374_v16 = vpop.eup %1373 }
 0x2a6   :  { %1281 = vmatpush3.bf16.msra.mxu1 %v1357_v10  ;;  %v855_v18 = vsel %vm854_vm3, %v852_v15, %v849_v13  ;;  %v858_v19 = vmul.f32 0.6931472, %v1374_v16 }
 0x2a7   :  { %1282 = vmatprep.subr.bf16.mxu1 %v1617_v0  ;;  %v865_v24 = vadd.f32 %v855_v18, %v837_v21 }
 0x2a8   :  { %v864_v23 = vsel %vm863_vm4, %v861_v20, %v858_v19 }
 0x2a9   :  { %v866_v25 = vadd.f32 %v864_v23, %v838_v22 }
 0x2aa   :  { %1283 = vmatpush3.bf16.msra.mxu1 %v1358_v17 }
 0x2ab   :  { %v867_v26 = vpack.c.bf16 %v866_v25, %v865_v24 }
 0x2ad   :  { %1285 = vmatmul.mubr.bf16.vlgmr.msra.gmra.mrb[8].mxu1 %v867_v26 }
 0x360   :  { %v624_v27 = vpop.f32.mrb[4].mxu1 }
 0x361   :  { %v1266_v28 = vpop.f32.mrb[5].mxu1  ;;  %v1891_v32 = vadd.f32 %v1093_v31, %v624_v27 }
 0x362   :  { %v627_v29 = vpop.f32.mrb[6].mxu1 }
 0x363   :  { %v1267_v30 = vpop.f32.mrb[7].mxu1  ;;  %v1893_v0 = vadd.f32 %v1093_v31, %v627_v29  ;;  %v633_v33 = vand.u32 2147483647, %v1891_v32  ;;  %v631_v16 = vmax.f32 %v1891_v32, 0.0 }
 0x365   :  { %v634_v34 = vand.u32 2147483647, %v1893_v0  ;;  %v635_v35 = vsub.f32 0.0, %v633_v33  ;;  %v632_v19 = vmax.f32 %v1893_v0, 0.0 }
 0x367   :  { %v636_v36 = vsub.f32 0.0, %v634_v34  ;;  %v637_v37 = vmul.f32 1.442695, %v635_v35 }
 0x369   :  { %v639_v38 = vmul.f32 1.442695, %v636_v36  ;;  %1375 = vpow2.f32 %v637_v37 }
 0x36b   :  { %1377 = vpow2.f32 %v639_v38 }
 0x373   :  { %v1376_v49 = vpop.eup %1375 }
 0x374   :  { %v641_v54 = vadd.f32 1.0, %v1376_v49  ;;  %v644_v59 = vmul.f32 -0.5, %v1376_v49  ;;  %v647_v3 = vand.u32 2147483647, %v1376_v49 }
 0x375   :  { %v1378_v52 = vpop.eup %1377 }
 0x376   :  { %v650_v55 = vadd.f32 1.0, %v1378_v52  ;;  %v653_v60 = vmul.f32 -0.5, %v1378_v52  ;;  %v645_v1 = vadd.f32 1.0, %v644_v59  ;;  %v656_v6 = vand.u32 2147483647, %v1378_v52 }
 0x377   :  { %vm648_vm5 = vcmp.lt.f32.partialorder %v647_v3, 0.0004427343 }
 0x378   :  { %v654_v4 = vadd.f32 1.0, %v653_v60  ;;  %v646_v9 = vmul.f32 %v1376_v49, %v645_v1  ;;  %vm657_vm6 = vcmp.lt.f32.partialorder %v656_v6, 0.0004427343 }
 0x37a   :  { %v655_v11 = vmul.f32 %v1378_v52, %v654_v4 }
 0x380   :  { %v973_v40 = vpop.f32.mrb[8].mxu1 }
 0x381   :  { %v974_v41 = vadd.f32 %v1119_v39, %v973_v40  ;;  %v1286_v42 = vpop.f32.mrb[9].mxu1 }
 0x382   :  { %v976_v43 = vpop.f32.mrb[10].mxu1  ;;  %v1010_v42 = vld [vmem:[#allocation2] sm:$0xff] }
 0x383   :  { %v982_v44 = vand.u32 2147483647, %v974_v41  ;;  %v977_v45 = vadd.f32 %v1119_v39, %v976_v43  ;;  %v1287_v46 = vpop.f32.mrb[11].mxu1  ;;  %v980_v24 = vmax.f32 %v974_v41, 0.0 }
 0x385   :  { %v984_v47 = vsub.f32 0.0, %v982_v44  ;;  %v983_v48 = vand.u32 2147483647, %v977_v45  ;;  %v981_v30 = vmax.f32 %v977_v45, 0.0  ;;  %v1011_v44 = vld [vmem:[#allocation2 + $0x8] sm:$0xff] }
 0x387   :  { %v986_v50 = vmul.f32 1.442695, %v984_v47  ;;  %v985_v51 = vsub.f32 0.0, %v983_v48 }
 0x389   :  { %1379 = vpow2.f32 %v986_v50  ;;  %v988_v53 = vmul.f32 1.442695, %v985_v51 }
 0x38b   :  { %1381 = vpow2.f32 %v988_v53 }
 0x38c   :  { %1383 = vlog2.f32 %v641_v54 }
 0x38d   :  { %1385 = vlog2.f32 %v650_v55 }
 0x393   :  { %v1380_v56 = vpop.eup %1379 }
 0x394   :  { %v990_v57 = vadd.f32 1.0, %v1380_v56  ;;  %v993_v2 = vmul.f32 -0.5, %v1380_v56  ;;  %v996_v12 = vand.u32 2147483647, %v1380_v56 }
 0x395   :  { %v1382_v58 = vpop.eup %1381 }
 0x396   :  { %1387 = vlog2.f32 %v990_v57  ;;  %v999_v61 = vadd.f32 1.0, %v1382_v58  ;;  %v1384_v62 = vpop.eup %1383  ;;  %v1002_v7 = vmul.f32 -0.5, %v1382_v58  ;;  %v994_v10 = vadd.f32 1.0, %v993_v2 }
 0x397   :  { %v1386_v63 = vpop.eup %1385  ;;  %v643_v5 = vmul.f32 0.6931472, %v1384_v62  ;;  %v1005_v18 = vand.u32 2147483647, %v1382_v58  ;;  %vm997_vm7 = vcmp.lt.f32.partialorder %v996_v12, 0.0004427343 }
 0x398   :  { %1389 = vlog2.f32 %v999_v61  ;;  %v652_v8 = vmul.f32 0.6931472, %v1386_v63  ;;  %v1003_v14 = vadd.f32 1.0, %v1002_v7  ;;  %v995_v21 = vmul.f32 %v1380_v56, %v994_v10 }
 0x399   :  { %v649_v13 = vsel %vm648_vm5, %v646_v9, %v643_v5  ;;  %vm1006_vm8 = vcmp.lt.f32.partialorder %v1005_v18, 0.0004427343 }
 0x39a   :  { %v658_v17 = vsel %vm657_vm6, %v655_v11, %v652_v8  ;;  %v659_v23 = vadd.f32 %v649_v13, %v631_v16  ;;  %v1004_v28 = vmul.f32 %v1382_v58, %v1003_v14 }
 0x39b   :  { %v660_v25 = vadd.f32 %v658_v17, %v632_v19 }
 0x39c   :  { %v1026_v35 = vmul.f32 %v659_v23, %v659_v23 }
 0x39d   :  { %v1027_v36 = vmul.f32 %v660_v25, %v660_v25 }
 0x3a0   :  { %v1388_v15 = vpop.eup %1387 }
 0x3a1   :  { %v992_v20 = vmul.f32 0.6931472, %v1388_v15 }
 0x3a2   :  { %v1390_v22 = vpop.eup %1389 }
 0x3a3   :  { %v998_v26 = vsel %vm997_vm7, %v995_v21, %v992_v20  ;;  %v1001_v27 = vmul.f32 0.6931472, %v1390_v22 }
 0x3a4   :  { %v1008_v29 = vadd.f32 %v998_v26, %v980_v24 }
 0x3a5   :  { %v1007_v31 = vsel %vm1006_vm8, %v1004_v28, %v1001_v27 }
 0x3a6   :  { %v1012_v33 = vmul.f32 0.5, %v1008_v29  ;;  %v1009_v32 = vadd.f32 %v1007_v31, %v981_v30  ;;  %v1024_v34 = vadd.f32 1.0, %v1008_v29 }
 0x3a8   :  { %v1014_v0 = vmul.f32 1.442695, %v1012_v33  ;;  %v1013_v37 = vmul.f32 0.5, %v1009_v32  ;;  %v1028_v38 = vsub.f32 %v1024_v34, %v1026_v35  ;;  %v1025_v39 = vadd.f32 1.0, %v1009_v32 }
 0x3aa   :  { %1391 = vpow2.f32 %v1014_v0  ;;  %v1016_v40 = vmul.f32 1.442695, %v1013_v37  ;;  %v1029_v41 = vsub.f32 %v1025_v39, %v1027_v36 }
 0x3ac   :  { %1393 = vpow2.f32 %v1016_v40 }
 0x3b4   :  { %v1392_v43 = vpop.eup %1391 }
 0x3b5   :  { %v1030_v46 = vmul.f32 %v1392_v43, %v1392_v43  ;;  %v1018_v45 = vmul.f32 %v1392_v43, %v1010_v42 }
 0x3b6   :  { %v1394_v47 = vpop.eup %1393 }
 0x3b7   :  { %v1032_v48 = vsub.f32 %v1028_v38, %v1030_v46  ;;  %v1031_v49 = vmul.f32 %v1394_v47, %v1394_v47  ;;  %v1019_v50 = vmul.f32 %v1394_v47, %v1011_v44  ;;  %v1020_v51 = vadd.f32 %v1018_v45, %v659_v23 }
 0x3b9   :  { %1034 = vadd.xlane.f32.xlu0 %v1032_v48  ;;  %v1033_v52 = vsub.f32 %v1029_v41, %v1031_v49  ;;  %v1021_v53 = vadd.f32 %v1019_v50, %v660_v25  ;;  %1022 = vst [vmem:[#allocation16] sm:$0xff] %v1020_v51 }
 0x3bb   :  { %1023 = vst [vmem:[#allocation16 + $0x8] sm:$0xff] %v1021_v53 }
 0x3bd   :  { %1036 = vadd.xlane.f32.xlu0 %v1033_v52 }
 0x3be   :  { %1582 = shalt.err (!%p1579_p12)
}
 0x3bf   :  { %s1583_s15 = scalar_lea.hbm %s1935_s12, 256 }
 0x3c0   :  { %p1584_p13 = scmp.ne.s32.totalorder %s1935_s12, %s1583_s15  ;;  %p1587_p0 = scmp.lt.u32.totalorder %s1583_s15, %s1935_s12 }
 0x3c2   :  { %p1589_p1 = pnand %p1587_p0, %p1584_p13 }
 0x3c4   :  { %1592 = shalt.err (!%p1589_p1)
}
 0x3c5   :  { %1054 = dma.vmem_to_hbm [thread:$0]  %s1049_s11, 256, %s1935_s12, [#allocation4], %s1607_s20, %s1607_s20, %s1608_s21   ;;  %vm1040_vm9 = vcmask 7168  }
 0x446   :  { %v1035_v54 = vpop.xlane.xlu0 %1034 }
 0x447   :  { %v1038_v55 = vmul.f32 -0.5, %v1035_v54 }
 0x449   :  { %1041 = vst.msk [vmem:[%s1936_s13] sm:$0xff] %vm1040_vm9, %v1038_v55 }
 0x44a   :  { %v1037_v56 = vpop.xlane.xlu0 %1036 }
 0x44b   :  { %v1039_v57 = vmul.f32 -0.5, %v1037_v56 }
 0x44d   :  { %1042 = vst.msk [vmem:[%s1936_s13 + $0x8] sm:$0xff] %vm1040_vm9, %v1039_v57 }
 0x44e   :  { %1603 = dma.done.wait [#allocation4], 256  }
 0x44f   :  { %1604 = vsyncadd [#allocation4], 4294967040 }
 0x450   :  { %1062 = vsyncpa [#allocation3], 1 }
 0x451   :  { %1063 = vsyncpa [#allocation6], 1 }
 0x452   :  { %1064 = vsyncpa [#allocation9], 1 }
 0x453   :  { %1065 = vsyncpa [#allocation12], 1 }
 0x454   :  { %1066 = vsyncpa [#allocation15], 1 }
 0x455   :  { %1067 = vsyncpa [#allocation4], 1 }

</bundles_post_ra>
